<compile_context>
chip_gen: v5e
topology: v5e:2x2
jax: 0.10.0
libtpu: 0.0.40
codegen_flags: <defaults>
</compile_context>

<pallas_src>
import functools

import jax
import jax.numpy as jnp
from jax.experimental import pallas as pl
from jax.experimental.pallas import tpu as pltpu


# --------------------------------------------------------------------------- #
# static helpers
# --------------------------------------------------------------------------- #
def _round_up(x, m):
    return ((x + m - 1) // m) * m


def _sel_matrix(num_kernel, n_agents):
    """(K*na, na) 0/1 matrix: SEL[h*na + j, j] = 1  (sum over heads)."""
    shape = (num_kernel * n_agents, n_agents)
    rows = jax.lax.broadcasted_iota(jnp.int32, shape, 0)
    cols = jax.lax.broadcasted_iota(jnp.int32, shape, 1)
    return (rows % n_agents == cols).astype(jnp.float32)


# --------------------------------------------------------------------------- #
# Pallas kernels (one row tile each)
# --------------------------------------------------------------------------- #
def _adv_kernel(n_agents, num_kernel, H,
                qmq_ref, xsa_ref, W1_ref, b1_ref, W2_ref, b2_ref, sel_ref,
                out_ref):
    """adv_tot (is_v=False).  Stage-1 column layout of `big`:
         [0, H)            hyper_w_final hidden (pre-ReLU)
         [H, H+Kna)        SI key pre-activations, replicated per agent (REP folded)
         [H+Kna, H+2Kna)   SI agents pre-activations
         [H+2Kna, H+3Kna)  SI action pre-activations
       V cancels out of adv_q = qs_t - mq_t, so it is not computed here."""
    K, na = num_kernel, n_agents
    Kna = K * na
    big = jnp.dot(xsa_ref[...], W1_ref[...],
                  preferred_element_type=jnp.float32) + b1_ref[...]
    h = jnp.maximum(big[:, :H], 0.0)

    si = big[:, H:H + 3 * Kna]                       # [key_rep | ag | acx]
    sig = jax.nn.sigmoid(si)                         # one EUP pass covers ag & acx
    w = ((jnp.abs(si[:, :Kna]) + 1e-10)
         * sig[:, Kna:2 * Kna] * sig[:, 2 * Kna:3 * Kna])
    adv_w = jnp.dot(w, sel_ref[...], preferred_element_type=jnp.float32)  # (T, na)

    o2 = jnp.dot(h.astype(W2_ref.dtype), W2_ref[...],
                 preferred_element_type=jnp.float32) + b2_ref[...]
    w_final = jnp.abs(o2) + 1e-10

    qmq = qmq_ref[...]                               # f32 [qs | mq]
    adv_q = w_final * (qmq[:, :na] - qmq[:, na:])    # == (w*qs+v) - (w*mq+v)
    # is_minus_one = True.  (tb, 1) output -> masked store, but output bytes
    # are ~1% of input bytes, so it is off the HBM roofline.
    out_ref[...] = jnp.sum(adv_q * (adv_w - 1.0), axis=1, keepdims=True)


def _v_kernel(n_agents, H,
              qs_ref, st_ref, W1_ref, b1_ref, W2_ref, b2_ref,
              out_ref):
    """v_tot = sum_i (w_final_i * q_i + v_i)  (is_v=True path)."""
    na = n_agents
    h = jnp.maximum(
        jnp.dot(st_ref[...], W1_ref[...], preferred_element_type=jnp.float32)
        + b1_ref[...], 0.0)                                          # (T, 2H)
    o2 = jnp.dot(h.astype(W2_ref.dtype), W2_ref[...],
                 preferred_element_type=jnp.float32) + b2_ref[...]   # (T, 2*na)
    w_final = jnp.abs(o2[:, :na]) + 1e-10
    v = o2[:, na:]
    qs = qs_ref[...]
    out_ref[...] = jnp.sum(w_final * qs + v, axis=1, keepdims=True)


def _both_kernel(n_agents, num_kernel, H,
                 qmq_ref, xsa_ref, W1_ref, b1_ref, W2_ref, b2_ref, sel_ref,
                 out_ref):
    """adv_tot and v_tot in one pass (shared MLPs / shared loads).
       `big` columns: [h_final (H) | h_V (H) | key_rep | ag | acx]."""
    K, na = num_kernel, n_agents
    Kna = K * na
    big = jnp.dot(xsa_ref[...], W1_ref[...],
                  preferred_element_type=jnp.float32) + b1_ref[...]
    h = jnp.maximum(big[:, :2 * H], 0.0)

    si = big[:, 2 * H:2 * H + 3 * Kna]
    sig = jax.nn.sigmoid(si)
    w = ((jnp.abs(si[:, :Kna]) + 1e-10)
         * sig[:, Kna:2 * Kna] * sig[:, 2 * Kna:3 * Kna])
    adv_w = jnp.dot(w, sel_ref[...], preferred_element_type=jnp.float32)  # (T, na)

    o2 = jnp.dot(h.astype(W2_ref.dtype), W2_ref[...],
                 preferred_element_type=jnp.float32) + b2_ref[...]        # (T, 2*na)
    w_final = jnp.abs(o2[:, :na]) + 1e-10
    v = o2[:, na:]

    qmq = qmq_ref[...]
    qs = qmq[:, :na]
    mq = qmq[:, na:]
    adv_q = w_final * (qs - mq)
    out_ref[:, 0:1] = jnp.sum(adv_q * (adv_w - 1.0), axis=1, keepdims=True)
    out_ref[:, 1:2] = jnp.sum(w_final * qs + v, axis=1, keepdims=True)


# --------------------------------------------------------------------------- #
# trace-time weight packing (done once in the wrapper, not in the kernel)
# --------------------------------------------------------------------------- #
def _block_diag(a, b):
    h1, n1 = a.shape
    h2, n2 = b.shape
    top = jnp.concatenate([a, jnp.zeros((h1, n2), a.dtype)], axis=1)
    bot = jnp.concatenate([jnp.zeros((h2, n1), b.dtype), b], axis=1)
    return jnp.concatenate([top, bot], axis=0)


def _pack_adv(params, act_dtype, n_agents):
    S, H = params["w1"].shape
    K = params["kW"].shape[1]
    Kna = params["aW"].shape[1]
    A = params["cW"].shape[0] - S
    # REP fold: exact column replication of kW/kb (abs commutes with it).
    kW_rep = jnp.repeat(params["kW"], n_agents, axis=1)          # (S, Kna)
    kb_rep = jnp.repeat(params["kb"], n_agents, axis=1)          # (1, Kna)
    top = jnp.concatenate(
        [params["w1"], kW_rep, params["aW"], params["cW"][:S]], axis=1)
    bot = jnp.concatenate(
        [jnp.zeros((A, H + 2 * Kna), jnp.float32), params["cW"][S:]], axis=1)
    W1 = jnp.concatenate([top, bot], axis=0)                     # (S+A, H+3Kna)
    b1 = jnp.concatenate(
        [params["b1"], kb_rep, params["ab"], params["cb"]], axis=1)
    sel = _sel_matrix(K, n_agents)
    return (W1.astype(act_dtype), b1.astype(jnp.float32),
            params["w2"].astype(act_dtype), params["b2"].astype(jnp.float32),
            sel)


def _pack_v(params, act_dtype):
    W1 = jnp.concatenate([params["w1"], params["vw1"]], axis=1)
    b1 = jnp.concatenate([params["b1"], params["vb1"]], axis=1)
    W2 = _block_diag(params["w2"], params["vw2"])
    b2 = jnp.concatenate([params["b2"], params["vb2"]], axis=1)
    return (W1.astype(act_dtype), b1.astype(jnp.float32),
            W2.astype(act_dtype), b2.astype(jnp.float32))


def _pack_both(params, act_dtype, n_agents):
    S, H = params["w1"].shape
    K = params["kW"].shape[1]
    Kna = params["aW"].shape[1]
    A = params["cW"].shape[0] - S
    kW_rep = jnp.repeat(params["kW"], n_agents, axis=1)
    kb_rep = jnp.repeat(params["kb"], n_agents, axis=1)
    top = jnp.concatenate(
        [params["w1"], params["vw1"], kW_rep, params["aW"], params["cW"][:S]],
        axis=1)
    bot = jnp.concatenate(
        [jnp.zeros((A, 2 * H + 2 * Kna), jnp.float32), params["cW"][S:]], axis=1)
    W1 = jnp.concatenate([top, bot], axis=0)                     # (S+A, 2H+3Kna)
    b1 = jnp.concatenate(
        [params["b1"], params["vb1"], kb_rep, params["ab"], params["cb"]], axis=1)
    W2 = _block_diag(params["w2"], params["vw2"])
    b2 = jnp.concatenate([params["b2"], params["vb2"]], axis=1)
    sel = _sel_matrix(K, n_agents)
    return (W1.astype(act_dtype), b1.astype(jnp.float32),
            W2.astype(act_dtype), b2.astype(jnp.float32), sel)


# --------------------------------------------------------------------------- #
# row-tiled pallas_call wrapper
# --------------------------------------------------------------------------- #
# Default row tile 2048 amortizes the ~0.35us/step grid overhead on every
# generation while keeping double-buffered inputs + lane-padded f32
# intermediates well under the 48 MiB limit below (safe on v5e, v6e and v7x's
# 64 MiB/TC).  v6e: tile_b up to 4096-8192 with a higher vmem_limit_bytes;
# v7x: stay <= 4096; v5e: stay <= 2048.
_DEFAULT_TILE_B = 2048
_VMEM_LIMIT_BYTES = 48 * 1024 * 1024


def _pick_tile(B, tile_b):
    tb = min(tile_b, _round_up(B, 16))
    return max(16, _round_up(tb, 16))   # 16: safe sublane multiple for bf16 rows


def _row_tiled_call(kernel, row_inputs, weights, out_shape, out_spec, tile_b):
    B = row_inputs[0].shape[0]
    # No full-array padding: grid = cdiv(B, tb); the partial last block is
    # handled by Pallas (math is strictly row-wise, tail rows are discarded).
    grid = (pl.cdiv(B, tile_b),)
    in_specs = ([pl.BlockSpec((tile_b, x.shape[1]), lambda i: (i, 0))
                 for x in row_inputs]
                + [pl.BlockSpec(w.shape, lambda i: (0, 0)) for w in weights])
    return pl.pallas_call(
        kernel,
        out_shape=out_shape,
        grid=grid,
        in_specs=in_specs,
        out_specs=out_spec,
        # Row-tile axis is embarrassingly parallel -> megacore sharding where
        # supported.  (See TODO(synk) at top re: CORE_PARALLEL on v7x.)
        compiler_params=pltpu.CompilerParams(
            dimension_semantics=("parallel",),
            vmem_limit_bytes=_VMEM_LIMIT_BYTES),
    )(*row_inputs, *weights)


# --------------------------------------------------------------------------- #
# public forward wrappers
# --------------------------------------------------------------------------- #
def dmaqer_forward(params, agent_qs, states, actions=None, max_q_i=None,
                   is_v=False, *, n_agents, n_actions, num_kernel,
                   act_dtype=jnp.bfloat16, tile_b=_DEFAULT_TILE_B):
    """Pallas forward of DMAQer.forward (weighted_head=True, is_minus_one=True)."""
    bs = agent_qs.shape[0]
    S, H = params["w1"].shape
    A = n_agents * n_actions

    # Q-values stay f32 (they feed TD targets linearly; ~16 extra B/row).
    qs = agent_qs.reshape(-1, n_agents).astype(jnp.float32)
    st = states.reshape(-1, S)
    B = qs.shape[0]
    tb = _pick_tile(B, tile_b)

    if is_v:
        W1, b1, W2, b2 = _pack_v(params, act_dtype)
        rows = [qs, st.astype(act_dtype)]
        weights = [W1, b1, W2, b2]
        kernel = functools.partial(_v_kernel, n_agents, H)
    else:
        ac = actions.reshape(-1, A)
        mq = max_q_i.reshape(-1, n_agents).astype(jnp.float32)
        qmq = jnp.concatenate([qs, mq], axis=1)                   # (B, 2*na) f32
        xsa = jnp.concatenate([st, ac], axis=1).astype(act_dtype)  # (B, S+A)
        W1, b1, W2, b2, sel = _pack_adv(params, act_dtype, n_agents)
        rows = [qmq, xsa]
        weights = [W1, b1, W2, b2, sel]
        kernel = functools.partial(_adv_kernel, n_agents, num_kernel, H)

    y = _row_tiled_call(
        kernel, rows, weights,
        jax.ShapeDtypeStruct((B, 1), jnp.float32),
        pl.BlockSpec((tb, 1), lambda i: (i, 0)),
        tb)
    return y.reshape(bs, -1, 1)


def dmaqer_forward_both(params, agent_qs, states, actions, max_q_i,
                        *, n_agents, n_actions, num_kernel,
                        act_dtype=jnp.bfloat16, tile_b=_DEFAULT_TILE_B):
    """adv_tot and v_tot in one fused kernel (typical QPLEX training step)."""
    bs = agent_qs.shape[0]
    S, H = params["w1"].shape
    A = n_agents * n_actions

    qs = agent_qs.reshape(-1, n_agents).astype(jnp.float32)
    mq = max_q_i.reshape(-1, n_agents).astype(jnp.float32)
    st = states.reshape(-1, S)
    ac = actions.reshape(-1, A)
    B = qs.shape[0]
    tb = _pick_tile(B, tile_b)

    qmq = jnp.concatenate([qs, mq], axis=1)
    xsa = jnp.concatenate([st, ac], axis=1).astype(act_dtype)
    W1, b1, W2, b2, sel = _pack_both(params, act_dtype, n_agents)
    kernel = functools.partial(_both_kernel, n_agents, num_kernel, H)

    y = _row_tiled_call(
        kernel, [qmq, xsa], [W1, b1, W2, b2, sel],
        jax.ShapeDtypeStruct((B, 2), jnp.float32),
        pl.BlockSpec((tb, 2), lambda i: (i, 0)),
        tb)
    adv = y[:, 0].reshape(bs, -1, 1)
    v = y[:, 1].reshape(bs, -1, 1)
    return adv, v


# --------------------------------------------------------------------------- #
# pure-JAX reference (mirrors the PyTorch forward exactly)
# --------------------------------------------------------------------------- #
def dmaqer_reference(params, agent_qs, states, actions, max_q_i, is_v,
                     *, n_agents, n_actions, num_kernel):
    bs = agent_qs.shape[0]
    state_dim = params["w1"].shape[0]
    st = states.reshape(-1, state_dim)
    qs = agent_qs.reshape(-1, n_agents)

    def mlp(x, w1, b1, w2, b2):
        return jnp.maximum(x @ w1 + b1, 0.0) @ w2 + b2

    w_final = jnp.abs(mlp(st, params["w1"], params["b1"],
                          params["w2"], params["b2"])) + 1e-10
    v = mlp(st, params["vw1"], params["vb1"], params["vw2"], params["vb2"])
    qs_t = w_final * qs + v
    if is_v:
        return jnp.sum(qs_t, axis=-1).reshape(bs, -1, 1)

    ac = actions.reshape(-1, n_agents * n_actions)
    mq = max_q_i.reshape(-1, n_agents)
    mq_t = w_final * mq + v
    adv_q = qs_t - mq_t
    data = jnp.concatenate([st, ac], axis=1)

    key_all = st @ params["kW"] + params["kb"]
    ag_all = st @ params["aW"] + params["ab"]
    ac_all = data @ params["cW"] + params["cb"]
    adv_w = jnp.zeros_like(qs)
    for h in range(num_kernel):
        xk = jnp.abs(key_all[:, h:h + 1]) + 1e-10
        xa = jax.nn.sigmoid(ag_all[:, h * n_agents:(h + 1) * n_agents])
        xc = jax.nn.sigmoid(ac_all[:, h * n_agents:(h + 1) * n_agents])
        adv_w = adv_w + xk * xa * xc
    adv_tot = jnp.sum(adv_q * (adv_w - 1.0), axis=1)
    return adv_tot.reshape(bs, -1, 1)


# --------------------------------------------------------------------------- #
# main
# --------------------------------------------------------------------------- #
if __name__ == "__main__":
    # small config consistent with the module; B = bs*T = 18 exercises the
    # partial-last-block (no padding) path.
    bs, T = 2, 9
    n_agents, n_actions = 4, 6
    state_dim = 32
    hypernet_embed = 32
    num_kernel = 4
    action_dim = n_agents * n_actions
    state_action_dim = state_dim + action_dim   # SI-weight's state_action_dim

    key = jax.random.PRNGKey(0)
    ks = jax.random.split(key, 24)

    def init(k, shape, scale=0.1):
        return (scale * jax.random.normal(k, shape)).astype(jnp.float32)

    params = {
        # hyper_w_final: Linear(S,H) -> ReLU -> Linear(H, n_agents)
        "w1": init(ks[0], (state_dim, hypernet_embed)),
        "b1": init(ks[1], (1, hypernet_embed)),
        "w2": init(ks[2], (hypernet_embed, n_agents)),
        "b2": init(ks[3], (1, n_agents)),
        # V: Linear(S,H) -> ReLU -> Linear(H, n_agents)
        "vw1": init(ks[4], (state_dim, hypernet_embed)),
        "vb1": init(ks[5], (1, hypernet_embed)),
        "vw2": init(ks[6], (hypernet_embed, n_agents)),
        "vb2": init(ks[7], (1, n_agents)),
        # DMAQ_SI_Weight, adv_hypernet_layers = 1, stacked over num_kernel heads
        "kW": init(ks[8], (state_dim, num_kernel)),
        "kb": init(ks[9], (1, num_kernel)),
        "aW": init(ks[10], (state_dim, num_kernel * n_agents)),
        "ab": init(ks[11], (1, num_kernel * n_agents)),
        "cW": init(ks[12], (state_action_dim, num_kernel * n_agents)),
        "cb": init(ks[13], (1, num_kernel * n_agents)),
    }

    agent_qs = init(ks[14], (bs, T, n_agents), scale=1.0)
    states = init(ks[15], (bs, T, state_dim), scale=1.0)
    max_q_i = init(ks[16], (bs, T, n_agents), scale=1.0)
    act_idx = jax.random.randint(ks[17], (bs, T, n_agents), 0, n_actions)
    actions = jax.nn.one_hot(act_idx, n_actions, dtype=jnp.float32)

    fwd = functools.partial(dmaqer_forward, n_agents=n_agents,
                            n_actions=n_actions, num_kernel=num_kernel)
    both = functools.partial(dmaqer_forward_both, n_agents=n_agents,
                             n_actions=n_actions, num_kernel=num_kernel)
    ref = functools.partial(dmaqer_reference, n_agents=n_agents,
                            n_actions=n_actions, num_kernel=num_kernel)

    adv_ref = ref(params, agent_qs, states, actions, max_q_i, False)
    v_ref = ref(params, agent_qs, states, actions, max_q_i, True)

    # 1) f32 activations, single (partial) row tile.
    #    (Default TPU matmul precision truncates f32 MXU operands to bf16 in
    #     both the kernel and the reference, hence the loose-ish tolerance.)
    adv = jax.block_until_ready(
        fwd(params, agent_qs, states, actions, max_q_i, is_v=False,
            act_dtype=jnp.float32))
    assert adv.shape == (bs, T, 1)
    assert jnp.allclose(adv, adv_ref, atol=1e-2, rtol=1e-2), "adv (f32) mismatch"

    v = jax.block_until_ready(
        fwd(params, agent_qs, states, actions, max_q_i, is_v=True,
            act_dtype=jnp.float32))
    assert v.shape == (bs, T, 1)
    assert jnp.allclose(v, v_ref, atol=1e-3, rtol=1e-3), "v (f32) mismatch"

    # 2) f32, forced multi-step grid (tile_b=16 -> 2 grid steps, partial tail).
    adv_t = jax.block_until_ready(
        fwd(params, agent_qs, states, actions, max_q_i, is_v=False,
            act_dtype=jnp.float32, tile_b=16))
    assert jnp.allclose(adv_t, adv_ref, atol=1e-2, rtol=1e-2), "adv (tiled) mismatch"

    # 3) bf16 fast path, fused adv+v kernel.  Kernel keeps qs/mq in f32, so the
    #    reference is evaluated on bf16-rounded states/actions only (isolates
    #    kernel math from input quantization).
    q8 = lambda x: x.astype(jnp.bfloat16).astype(jnp.float32)
    adv_ref_bf = ref(params, agent_qs, q8(states), q8(actions), max_q_i, False)
    v_ref_bf = ref(params, agent_qs, q8(states), q8(actions), max_q_i, True)

    adv_b, v_b = both(params, agent_qs, states, actions, max_q_i)
    adv_b = jax.block_until_ready(adv_b)
    v_b = jax.block_until_ready(v_b)
    assert adv_b.shape == (bs, T, 1) and v_b.shape == (bs, T, 1)
    assert jnp.allclose(adv_b, adv_ref_bf, atol=5e-2, rtol=5e-2), "adv (bf16) mismatch"
    assert jnp.allclose(v_b, v_ref_bf, atol=5e-2, rtol=5e-2), "v (bf16) mismatch"

    print("KERNEL_OK")
</pallas_src>

<mosaic_0001>
module attributes {stable_mosaic.version = 11 : i64} {
  func.func @_adv_kernel(%arg0: i32, %arg1: memref<32x8xf32, #tpu.memory_space<vmem>>, %arg2: memref<32x56xf32, #tpu.memory_space<vmem>>, %arg3: memref<56x80xf32, #tpu.memory_space<vmem>>, %arg4: memref<1x80xf32, #tpu.memory_space<vmem>>, %arg5: memref<32x4xf32, #tpu.memory_space<vmem>>, %arg6: memref<1x4xf32, #tpu.memory_space<vmem>>, %arg7: memref<16x4xf32, #tpu.memory_space<vmem>>, %arg8: memref<32x1xf32, #tpu.memory_space<vmem>>) attributes {dimension_semantics = [#tpu.dimension_semantics<parallel>], iteration_bounds = array<i64: 1>, scalar_prefetch = 0 : i64, scratch_operands = 0 : i64, tpu.core_type = #tpu.core_type<tc>, window_params = [{transform_indices = @transform_0, window_bounds = array<i64: 32, 8>}, {transform_indices = @transform_1, window_bounds = array<i64: 32, 56>}, {pipeline_mode = #tpu.pipeline_mode<synchronous>, transform_indices = @transform_2, window_bounds = array<i64: 56, 80>}, {pipeline_mode = #tpu.pipeline_mode<synchronous>, transform_indices = @transform_3, window_bounds = array<i64: 1, 80>}, {pipeline_mode = #tpu.pipeline_mode<synchronous>, transform_indices = @transform_4, window_bounds = array<i64: 32, 4>}, {pipeline_mode = #tpu.pipeline_mode<synchronous>, transform_indices = @transform_5, window_bounds = array<i64: 1, 4>}, {pipeline_mode = #tpu.pipeline_mode<synchronous>, transform_indices = @transform_6, window_bounds = array<i64: 16, 4>}, {transform_indices = @transform_7, window_bounds = array<i64: 32, 1>}]} {
    %c0 = arith.constant 0 : index
    %c0_0 = arith.constant 0 : index
    %0 = vector.load %arg2[%c0, %c0_0] : memref<32x56xf32, #tpu.memory_space<vmem>>, vector<32x56xf32>
    %c0_1 = arith.constant 0 : index
    %c0_2 = arith.constant 0 : index
    %1 = vector.load %arg3[%c0_1, %c0_2] : memref<56x80xf32, #tpu.memory_space<vmem>>, vector<56x80xf32>
    %cst = arith.constant dense<0.000000e+00> : vector<32x80xf32>
    %2 = tpu.matmul %0, %1, %cst {dimension_numbers = #tpu.dot_dimension_numbers<[1], [0], [0], [1], [0, 0, 1, 1], [], []>} : vector<32x56xf32>, vector<56x80xf32>, vector<32x80xf32> -> vector<32x80xf32>
    %c0_3 = arith.constant 0 : index
    %c0_4 = arith.constant 0 : index
    %3 = vector.load %arg4[%c0_3, %c0_4] : memref<1x80xf32, #tpu.memory_space<vmem>>, vector<1x80xf32>
    %4 = vector.broadcast %3 : vector<1x80xf32> to vector<32x80xf32>
    %5 = arith.addf %2, %4 : vector<32x80xf32>
    %6 = vector.extract_strided_slice %5 {offsets = [0, 0], sizes = [32, 32], strides = [1, 1]} : vector<32x80xf32> to vector<32x32xf32>
    %cst_5 = arith.constant 0.000000e+00 : f32
    %7 = vector.broadcast %cst_5 : f32 to vector<32x32xf32>
    %8 = arith.maximumf %6, %7 : vector<32x32xf32>
    %9 = vector.extract_strided_slice %5 {offsets = [0, 32], sizes = [32, 48], strides = [1, 1]} : vector<32x80xf32> to vector<32x48xf32>
    %10 = arith.negf %9 : vector<32x48xf32>
    %11 = math.exp %10 : vector<32x48xf32>
    %cst_6 = arith.constant 1.000000e+00 : f32
    %12 = vector.broadcast %cst_6 : f32 to vector<32x48xf32>
    %13 = arith.addf %12, %11 : vector<32x48xf32>
    %14 = arith.divf %12, %13 : vector<32x48xf32>
    %15 = vector.extract_strided_slice %9 {offsets = [0, 0], sizes = [32, 16], strides = [1, 1]} : vector<32x48xf32> to vector<32x16xf32>
    %16 = math.absf %15 : vector<32x16xf32>
    %cst_7 = arith.constant 1.000000e-10 : f32
    %17 = vector.broadcast %cst_7 : f32 to vector<32x16xf32>
    %18 = arith.addf %16, %17 : vector<32x16xf32>
    %19 = vector.extract_strided_slice %14 {offsets = [0, 16], sizes = [32, 16], strides = [1, 1]} : vector<32x48xf32> to vector<32x16xf32>
    %20 = arith.mulf %18, %19 : vector<32x16xf32>
    %21 = vector.extract_strided_slice %14 {offsets = [0, 32], sizes = [32, 16], strides = [1, 1]} : vector<32x48xf32> to vector<32x16xf32>
    %22 = arith.mulf %20, %21 : vector<32x16xf32>
    %c0_8 = arith.constant 0 : index
    %c0_9 = arith.constant 0 : index
    %23 = vector.load %arg7[%c0_8, %c0_9] : memref<16x4xf32, #tpu.memory_space<vmem>>, vector<16x4xf32>
    %cst_10 = arith.constant dense<0.000000e+00> : vector<32x4xf32>
    %24 = tpu.matmul %22, %23, %cst_10 {dimension_numbers = #tpu.dot_dimension_numbers<[1], [0], [0], [1], [0, 0, 1, 1], [], []>} : vector<32x16xf32>, vector<16x4xf32>, vector<32x4xf32> -> vector<32x4xf32>
    %c0_11 = arith.constant 0 : index
    %c0_12 = arith.constant 0 : index
    %25 = vector.load %arg5[%c0_11, %c0_12] : memref<32x4xf32, #tpu.memory_space<vmem>>, vector<32x4xf32>
    %cst_13 = arith.constant dense<0.000000e+00> : vector<32x4xf32>
    %26 = tpu.matmul %8, %25, %cst_13 {dimension_numbers = #tpu.dot_dimension_numbers<[1], [0], [0], [1], [0, 0, 1, 1], [], []>} : vector<32x32xf32>, vector<32x4xf32>, vector<32x4xf32> -> vector<32x4xf32>
    %c0_14 = arith.constant 0 : index
    %c0_15 = arith.constant 0 : index
    %27 = vector.load %arg6[%c0_14, %c0_15] : memref<1x4xf32, #tpu.memory_space<vmem>>, vector<1x4xf32>
    %28 = vector.broadcast %27 : vector<1x4xf32> to vector<32x4xf32>
    %29 = arith.addf %26, %28 : vector<32x4xf32>
    %30 = math.absf %29 : vector<32x4xf32>
    %cst_16 = arith.constant 1.000000e-10 : f32
    %31 = vector.broadcast %cst_16 : f32 to vector<32x4xf32>
    %32 = arith.addf %30, %31 : vector<32x4xf32>
    %c0_17 = arith.constant 0 : index
    %c0_18 = arith.constant 0 : index
    %33 = vector.load %arg1[%c0_17, %c0_18] : memref<32x8xf32, #tpu.memory_space<vmem>>, vector<32x8xf32>
    %34 = vector.extract_strided_slice %33 {offsets = [0, 0], sizes = [32, 4], strides = [1, 1]} : vector<32x8xf32> to vector<32x4xf32>
    %35 = vector.extract_strided_slice %33 {offsets = [0, 4], sizes = [32, 4], strides = [1, 1]} : vector<32x8xf32> to vector<32x4xf32>
    %36 = arith.subf %34, %35 : vector<32x4xf32>
    %37 = arith.mulf %32, %36 : vector<32x4xf32>
    %cst_19 = arith.constant 1.000000e+00 : f32
    %38 = vector.broadcast %cst_19 : f32 to vector<32x4xf32>
    %39 = arith.subf %24, %38 : vector<32x4xf32>
    %40 = arith.mulf %37, %39 : vector<32x4xf32>
    %cst_20 = arith.constant dense<0.000000e+00> : vector<32xf32>
    %41 = vector.multi_reduction <add>, %40, %cst_20 [1] : vector<32x4xf32> to vector<32xf32>
    %42 = vector.shape_cast %41 : vector<32xf32> to vector<32x1xf32>
    %c0_21 = arith.constant 0 : index
    %c0_22 = arith.constant 0 : index
    %43 = vector.load %arg8[%c0_21, %c0_22] : memref<32x1xf32, #tpu.memory_space<vmem>>, vector<32x1xf32>
    tpu.vector_store %arg8[%c0_21, %c0_22], %42 {strides = array<i32>} : memref<32x1xf32, #tpu.memory_space<vmem>>, vector<32x1xf32>,
    return
  }
  func.func @transform_0(%arg0: i32) -> (i32, i32) {
    %c0_i32 = arith.constant 0 : i32
    %c0_i32_0 = arith.constant 0 : i32
    return %arg0, %c0_i32 : i32, i32
  }
  func.func @transform_1(%arg0: i32) -> (i32, i32) {
    %c0_i32 = arith.constant 0 : i32
    %c0_i32_0 = arith.constant 0 : i32
    return %arg0, %c0_i32 : i32, i32
  }
  func.func @transform_2(%arg0: i32) -> (i32, i32) {
    %c0_i32 = arith.constant 0 : i32
    %c0_i32_0 = arith.constant 0 : i32
    %c0_i32_1 = arith.constant 0 : i32
    return %c0_i32, %c0_i32_0 : i32, i32
  }
  func.func @transform_3(%arg0: i32) -> (i32, i32) {
    %c0_i32 = arith.constant 0 : i32
    %c0_i32_0 = arith.constant 0 : i32
    %c0_i32_1 = arith.constant 0 : i32
    return %c0_i32, %c0_i32_0 : i32, i32
  }
  func.func @transform_4(%arg0: i32) -> (i32, i32) {
    %c0_i32 = arith.constant 0 : i32
    %c0_i32_0 = arith.constant 0 : i32
    %c0_i32_1 = arith.constant 0 : i32
    return %c0_i32, %c0_i32_0 : i32, i32
  }
  func.func @transform_5(%arg0: i32) -> (i32, i32) {
    %c0_i32 = arith.constant 0 : i32
    %c0_i32_0 = arith.constant 0 : i32
    %c0_i32_1 = arith.constant 0 : i32
    return %c0_i32, %c0_i32_0 : i32, i32
  }
  func.func @transform_6(%arg0: i32) -> (i32, i32) {
    %c0_i32 = arith.constant 0 : i32
    %c0_i32_0 = arith.constant 0 : i32
    %c0_i32_1 = arith.constant 0 : i32
    return %c0_i32, %c0_i32_0 : i32, i32
  }
  func.func @transform_7(%arg0: i32) -> (i32, i32) {
    %c0_i32 = arith.constant 0 : i32
    %c0_i32_0 = arith.constant 0 : i32
    return %arg0, %c0_i32 : i32, i32
  }
}

</mosaic_0001>

<bundles_post_ra>
// kernel: tpu_custom_call.1
= control target key start
LH: loop header
LB: loop body
LE: loop exit
PB: predicated region body
PF: predicated region fallthrough
CT: control target
= control target key end

     0   :  { %12 = vsyncpa [#allocation3], 0  ;;  %s669_s0 = inlined_call_operand.vmem [shape: f32[18,8], index: 0, kind: input, shape index: {}]   ;;  %s670_s1 = inlined_call_operand.hbm [shape: f32[18,56], index: 1, kind: input, shape index: {}]   ;;  %s671_s2 = inlined_call_operand.vmem [shape: f32[56,80], index: 2, kind: input, shape index: {}]   ;;  %s672_s3 = inlined_call_operand.vmem [shape: f32[1,80], index: 3, kind: input, shape index: {}]   ;;  %s673_s4 = inlined_call_operand.vmem [shape: f32[32,4], index: 4, kind: input, shape index: {}]   ;;  %s674_s5 = inlined_call_operand.vmem [shape: f32[1,4], index: 5, kind: input, shape index: {}]   ;;  %s675_s6 = inlined_call_operand.vmem [shape: f32[16,4], index: 6, kind: input, shape index: {}]   ;;  %s676_s7 = inlined_call_operand.vmem [shape: f32[18,1], index: 7, kind: output, shape index: {}]  }
   0x1   :  { %18 = vsyncadd [#allocation3], 128  ;;  %s19_s26 = sshll.u32 %s670_s1, 4  ;;  %s514_s27 = smov [#allocation2]   ;;  %s20_s26 = int_to_ptr.hbm [resolvable:$true] %s19_s26 }
   0x2   :  { %s21_s28 = sshll.u32 %s514_s27, 4  ;;  %s515_s29 = smov 128   ;;  %s22_s28 = int_to_ptr.vmem [resolvable:$true] %s21_s28 }
   0x3   :  { %s516_s30 = smov 8  }
   0x4   :  { %27 = dma.hbm_to_vmem [thread:$0]  %s20_s26, 384, %s22_s28, [#allocation3], %s515_s29, %s515_s29, %s516_s30  }
   0x5   :  { %512 = dma.done.wait [#allocation3], 512  }
   0x6   :  { %513 = vsyncadd [#allocation3], 4294966784  ;;  %v52_v0 = vld [vmem:[%s671_s2 + $0x30] sm:$0xff]  ;;  %v51_v1 = vld [vmem:[%s671_s2 + $0x28] sm:$0xff]  ;;  %vm57_vm0 = vcmask 457728   ;;  %vm283_vm1 = vcmask 261120  }
   0x7   :  { %79 = vmatpush.msra.mxu0 %v52_v0  ;;  %457 = vmatpush.msra.mxu3 %v52_v0  ;;  %v50_v2 = vld [vmem:[%s671_s2 + $0x20] sm:$0xff]  ;;  %v278_v3 = vld [vmem:[%s673_s4 + $0x18] sm:$0xff]  ;;  %v48_v5 = vld [vmem:[%s671_s2 + $0x10] sm:$0xff]  ;;  %s519_s12 = smov 124  }
   0x8   :  { %v49_v4 = vld [vmem:[%s671_s2 + $0x18] sm:$0xff]  ;;  %308 = vmatpush.msra.mxu2 %v278_v3  ;;  %v47_v6 = vld [vmem:[%s671_s2 + $0x8] sm:$0xff]  ;;  %v46_v7 = vld [vmem:[%s671_s2] sm:$0xff] }
   0x9   :  { %80 = vmatpush.msra.mxu0 %v51_v1  ;;  %458 = vmatpush.msra.mxu3 %v51_v1  ;;  %v42_v8 = vld [vmem:[#allocation2] sm:$0xff]  ;;  %v43_v9 = vld [vmem:[#allocation2 + $0x8] sm:$0xff]  ;;  %v44_v10 = vld [vmem:[#allocation2 + $0x10] sm:$0xff] }
   0xa   :  { %v45_v11 = vld [vmem:[#allocation2 + $0x18] sm:$0xff]  ;;  %v277_v12 = vld [vmem:[%s673_s4 + $0x10] sm:$0xff]  ;;  %v276_v13 = vld [vmem:[%s673_s4 + $0x8] sm:$0xff] }
   0xb   :  { %81 = vmatpush.msra.mxu0 %v50_v2  ;;  %459 = vmatpush.msra.mxu3 %v50_v2  ;;  %v275_v14 = vld [vmem:[%s673_s4] sm:$0xff]  ;;  %s518_s4 = smov 96  }
   0xc   :  { %309 = vmatpush.msra.mxu2 %v277_v12  ;;  %v470_v15 = vld [vmem:[%s672_s3] ss:$0 sm:$0xff]  ;;  %s517_s3 = smov 112  }
   0xd   :  { %82 = vmatpush.msra.mxu0 %v49_v4  ;;  %460 = vmatpush.msra.mxu3 %v49_v4 }
   0xe   :  { %310 = vmatpush.msra.mxu2 %v276_v13 }
   0xf   :  { %83 = vmatpush.msra.mxu0 %v48_v5  ;;  %461 = vmatpush.msra.mxu3 %v48_v5 }
  0x10   :  { %311 = vmatpush.msra.mxu2 %v275_v14 }
  0x11   :  { %84 = vmatpush.msra.mxu0 %v47_v6  ;;  %462 = vmatpush.msra.mxu3 %v47_v6 }
  0x13   :  { %85 = vmatpush.msra.mxu0 %v46_v7  ;;  %463 = vmatpush.msra.mxu3 %v46_v7 }
  0x14   :  { %437 = vmatmul.msk.f32.vlgmr.msra.gmra.mxu0 %vm57_vm0, %v42_v8  ;;  %438 = vmatmul.msk.f32.vlgmr.msra.gmra.mxu3 %vm57_vm0, %v43_v9 }
  0x1c   :  { %439 = vmatmul.msk.f32.gmra.mxu3 %vm57_vm0, %v44_v10 }
  0x24   :  { %440 = vmatmul.msk.f32.gmra.mxu3 %vm57_vm0, %v45_v11 }
  0x91   :  { %v87_v16 = vpop.f32.mrf.mxu0 }
  0x92   :  { %v599_v17 = vadd.f32 %v470_v15, %v87_v16 }
  0x94   :  { %v441_v18 = vmul.f32 -1.442695, %v599_v17  ;;  %v99_v19 = vmax.f32 %v599_v17, 0.0 }
  0x96   :  { %472 = vpow2.f32 %v441_v18  ;;  %449 = vmatmul.msk.f32.vlgmr.msra.gmra.mxu2 %vm283_vm1, %v99_v19 }
  0x97   :  { %v90_v20 = vpop.f32.mrf.mxu3 }
  0x98   :  { %v604_v21 = vadd.f32 %v470_v15, %v90_v20 }
  0x9a   :  { %v442_v22 = vmul.f32 -1.442695, %v604_v21  ;;  %v100_v24 = vmax.f32 %v604_v21, 0.0 }
  0x9c   :  { %v473_v23 = vpop.eup %472  ;;  %474 = vpow2.f32 %v442_v22 }
  0x9d   :  { %v115_v25 = vadd.f32 1.0, %v473_v23 }
  0x9e   :  { %450 = vmatmul.msk.f32.gmra.mxu2 %vm283_vm1, %v100_v24 }
  0x9f   :  { %476 = vrcp.f32 %v115_v25  ;;  %v93_v26 = vpop.f32.mrf.mxu3  ;;  %vm124_vm2 = vweird.f32 %v115_v25  ;;  %v130_v35 = vand.u32 2147483648, %v115_v25  ;;  %v128_v38 = vand.u32 2147483647, %v115_v25 }
  0xa0   :  { %v609_v27 = vadd.f32 %v470_v15, %v93_v26  ;;  %v224_v26 = vld [vmem:[%s675_s6 + $0x8] sm:$0xff] }
  0xa1   :  { %v131_v45 = vor.u32 1.1754944e-38, %v130_v35  ;;  %vm129_vm5 = vcmp.eq.f32.partialorder %v128_v38, 8.507059e+37  ;;  %260 = vmatpush.msra.mxu1 %v224_v26 }
  0xa2   :  { %v475_v28 = vpop.eup %474  ;;  %v443_v29 = vmul.f32 -1.442695, %v609_v27  ;;  %v101_v30 = vmax.f32 %v609_v27, 0.0  ;;  %v181_v18 = vand.u32 2147483647, %v609_v27 }
  0xa3   :  { %v116_v31 = vadd.f32 1.0, %v475_v28  ;;  %v223_v28 = vld [vmem:[%s675_s6] sm:$0xff] }
  0xa4   :  { %478 = vpow2.f32 %v443_v29  ;;  %v185_v19 = vadd.f32 1e-10, %v181_v18  ;;  %261 = vmatpush.msra.mxu1 %v223_v28 }
  0xa5   :  { %v477_v32 = vpop.eup %476  ;;  %480 = vrcp.f32 %v116_v31  ;;  %v145_v51 = vand.u32 2147483648, %v116_v31  ;;  %v143_v53 = vand.u32 2147483647, %v116_v31  ;;  %vm139_vm7 = vweird.f32 %v116_v31 }
  0xa6   :  { %v120_v33 = vmul.f32 %v477_v32, %v115_v25  ;;  %451 = vmatmul.msk.f32.gmra.mxu2 %vm283_vm1, %v101_v30  ;;  %vm125_vm3 = vweird.f32 %v477_v32  ;;  %v179_v25 = vand.u32 2147483647, %v599_v17  ;;  %v334_v30 = vld [vmem:[%s669_s0 + $0x8] sm:$0xff]  ;;  %v180_v17 = vand.u32 2147483647, %v604_v21  ;;  %v333_v21 = vld [vmem:[%s669_s0] sm:$0xff] }
  0xa7   :  { %v96_v34 = vpop.f32.mrf.mxu3  ;;  %vm126_vm4 = vmor %vm124_vm2, %vm125_vm3  ;;  %v146_v58 = vor.u32 1.1754944e-38, %v145_v51  ;;  %vm144_vm9 = vcmp.eq.f32.partialorder %v143_v53, 8.507059e+37  ;;  %vm237_vm2 = vcmask 130048   ;;  %vm369_vm3 = vcmask 31744  }
  0xa8   :  { %v614_v36 = vadd.f32 %v470_v15, %v96_v34  ;;  %v121_v37 = vsub.f32 1.0, %v120_v33  ;;  %v183_v29 = vadd.f32 1e-10, %v179_v25  ;;  %v184_v34 = vadd.f32 1e-10, %v180_v17 }
  0xaa   :  { %v479_v39 = vpop.eup %478  ;;  %v444_v40 = vmul.f32 -1.442695, %v614_v36  ;;  %v122_v41 = vmul.f32 %v477_v32, %v121_v37  ;;  %v102_v42 = vmax.f32 %v614_v36, 0.0 }
  0xab   :  { %v481_v43 = vpop.eup %480  ;;  %v117_v44 = vadd.f32 1.0, %v479_v39  ;;  %v182_v39 = vand.u32 2147483647, %v614_v36  ;;  %v335_v36 = vld [vmem:[%s669_s0 + $0x10] sm:$0xff] }
  0xac   :  { %482 = vpow2.f32 %v444_v40  ;;  %v123_v46 = vadd.f32 %v477_v32, %v122_v41  ;;  %v135_v47 = vmul.f32 %v481_v43, %v116_v31  ;;  %vm140_vm6 = vweird.f32 %v481_v43 }
  0xad   :  { %484 = vrcp.f32 %v117_v44  ;;  %vm141_vm8 = vmor %vm139_vm7, %vm140_vm6  ;;  %v160_v62 = vand.u32 2147483648, %v117_v44  ;;  %vm154_vm10 = vweird.f32 %v117_v44  ;;  %v158_v0 = vand.u32 2147483647, %v117_v44 }
  0xae   :  { %v127_v48 = vsel %vm126_vm4, %v477_v32, %v123_v46  ;;  %v136_v49 = vsub.f32 1.0, %v135_v47  ;;  %452 = vmatmul.msk.f32.gmra.mxu2 %vm283_vm1, %v102_v42  ;;  %v186_v40 = vadd.f32 1e-10, %v182_v39  ;;  %vm382_vm4 = vcmask 7168  }
  0xaf   :  { %v132_v50 = vsel %vm129_vm5, %v131_v45, %v127_v48  ;;  %v161_v2 = vor.u32 1.1754944e-38, %v160_v62  ;;  %vm159_vm13 = vcmp.eq.f32.partialorder %v158_v0, 8.507059e+37  ;;  %v336_v45 = vld [vmem:[%s669_s0 + $0x18] sm:$0xff] }
  0xb0   :  { %191 = vrot.lane.b32.xlu0 %v132_v50, %s517_s3  ;;  %v137_v52 = vmul.f32 %v481_v43, %v136_v49 }
  0xb2   :  { %v483_v54 = vpop.eup %482  ;;  %v138_v55 = vadd.f32 %v481_v43, %v137_v52 }
  0xb3   :  { %v485_v56 = vpop.eup %484  ;;  %v118_v57 = vadd.f32 1.0, %v483_v54 }
  0xb4   :  { %v142_v59 = vsel %vm141_vm8, %v481_v43, %v138_v55  ;;  %v150_v60 = vmul.f32 %v485_v56, %v117_v44  ;;  %vm155_vm11 = vweird.f32 %v485_v56 }
  0xb5   :  { %486 = vrcp.f32 %v118_v57  ;;  %v147_v61 = vsel %vm144_vm9, %v146_v58, %v142_v59  ;;  %vm156_vm12 = vmor %vm154_vm10, %vm155_vm11  ;;  %v175_v8 = vand.u32 2147483648, %v118_v57  ;;  %vm169_vm14 = vweird.f32 %v118_v57 }
  0xb6   :  { %193 = vrot.lane.b32.xlu1 %v147_v61, %s517_s3  ;;  %v151_v63 = vsub.f32 1.0, %v150_v60  ;;  %v173_v10 = vand.u32 2147483647, %v118_v57 }
  0xb7   :  { %v176_v12 = vor.u32 1.1754944e-38, %v175_v8 }
  0xb8   :  { %207 = vrot.lane.b32.xlu0 %v132_v50, %s518_s4  ;;  %v152_v1 = vmul.f32 %v485_v56, %v151_v63  ;;  %vm174_vm1 = vcmp.eq.f32.partialorder %v173_v10, 8.507059e+37  ;;  %v471_v50 = vld [vmem:[%s674_s5] ss:$0 sm:$0xff] }
  0xba   :  { %v153_v3 = vadd.f32 %v485_v56, %v152_v1 }
  0xbb   :  { %v487_v4 = vpop.eup %486 }
  0xbc   :  { %v157_v5 = vsel %vm156_vm12, %v485_v56, %v153_v3  ;;  %v165_v6 = vmul.f32 %v487_v4, %v118_v57  ;;  %vm170_vm15 = vweird.f32 %v487_v4 }
  0xbd   :  { %v162_v7 = vsel %vm159_vm13, %v161_v2, %v157_v5  ;;  %vm171_vm0 = vmor %vm169_vm14, %vm170_vm15 }
  0xbe   :  { %195 = vrot.lane.b32.xlu2 %v162_v7, %s517_s3  ;;  %209 = vrot.lane.b32.xlu1 %v147_v61, %s518_s4  ;;  %v166_v9 = vsub.f32 1.0, %v165_v6 }
  0xc0   :  { %v167_v11 = vmul.f32 %v487_v4, %v166_v9 }
  0xc2   :  { %v168_v13 = vadd.f32 %v487_v4, %v167_v11 }
  0xc4   :  { %v172_v14 = vsel %vm171_vm0, %v487_v4, %v168_v13 }
  0xc5   :  { %v177_v15 = vsel %vm174_vm1, %v176_v12, %v172_v14 }
  0xc6   :  { %211 = vrot.lane.b32.xlu2 %v162_v7, %s518_s4  ;;  %197 = vrot.lane.b32.xlu0 %v177_v15, %s517_s3 }
  0xc7   :  { %213 = vrot.lane.b32.xlu1 %v177_v15, %s518_s4 }
 0x118   :  { %v196_v16 = vpop.permute.xlu2 %195 }
 0x119   :  { %v205_v20 = vmul.f32 %v196_v16, %v185_v19  ;;  %v313_v51 = vpop.f32.mrf.mxu2 }
 0x11a   :  { %v314_v52 = vadd.f32 %v471_v50, %v313_v51 }
 0x11c   :  { %v325_v54 = vand.u32 2147483647, %v314_v52 }
 0x11e   :  { %v329_v56 = vadd.f32 1e-10, %v325_v54 }
 0x120   :  { %v212_v22 = vpop.permute.xlu2 %211 }
 0x121   :  { %v221_v23 = vmul.f32 %v212_v22, %v205_v20  ;;  %v316_v62 = vpop.f32.mrf.mxu2 }
 0x122   :  { %v192_v24 = vpop.permute.xlu0 %191  ;;  %v317_v63 = vadd.f32 %v471_v50, %v316_v62 }
 0x123   :  { %233 = vrot.lane.b32.xlu1 %v221_v23, %s518_s4  ;;  %v203_v31 = vmul.f32 %v192_v24, %v183_v29 }
 0x124   :  { %v326_v1 = vand.u32 2147483647, %v317_v63 }
 0x126   :  { %v330_v4 = vadd.f32 1e-10, %v326_v1 }
 0x128   :  { %v194_v27 = vpop.permute.xlu1 %193 }
 0x129   :  { %v204_v35 = vmul.f32 %v194_v27, %v184_v34  ;;  %v319_v2 = vpop.f32.mrf.mxu2 }
 0x12a   :  { %v208_v32 = vpop.permute.xlu0 %207  ;;  %v320_v5 = vadd.f32 %v471_v50, %v319_v2 }
 0x12b   :  { %v219_v33 = vmul.f32 %v208_v32, %v203_v31  ;;  %343 = vrot.lane.b32.xlu1 %v334_v30, %s519_s12 }
 0x12c   :  { %v327_v10 = vand.u32 2147483647, %v320_v5 }
 0x12d   :  { %229 = vrot.lane.b32.xlu2 %v219_v33, %s518_s4 }
 0x12e   :  { %v331_v15 = vadd.f32 1e-10, %v327_v10 }
 0x130   :  { %v210_v37 = vpop.permute.xlu1 %209 }
 0x131   :  { %v220_v38 = vmul.f32 %v210_v37, %v204_v35  ;;  %v322_v12 = vpop.f32.mrf.mxu2 }
 0x132   :  { %v323_v16 = vadd.f32 %v471_v50, %v322_v12 }
 0x133   :  { %231 = vrot.lane.b32.xlu0 %v220_v38, %s518_s4 }
 0x134   :  { %v328_v23 = vand.u32 2147483647, %v323_v16 }
 0x136   :  { %v332_v28 = vadd.f32 1e-10, %v328_v23 }
 0x138   :  { %v198_v41 = vpop.permute.xlu0 %197 }
 0x139   :  { %v206_v42 = vmul.f32 %v198_v41, %v186_v40  ;;  %v214_v43 = vpop.permute.xlu1 %213 }
 0x13b   :  { %v222_v44 = vmul.f32 %v214_v43, %v206_v42  ;;  %341 = vrot.lane.b32.xlu0 %v333_v21, %s519_s12 }
 0x13d   :  { %235 = vrot.lane.b32.xlu2 %v222_v44, %s518_s4 }
 0x143   :  { %347 = vrot.lane.b32.xlu0 %v336_v45, %s519_s12 }
 0x145   :  { %345 = vrot.lane.b32.xlu2 %v335_v36, %s519_s12 }
 0x187   :  { %v230_v46 = vpop.permute.xlu2 %229 }
 0x188   :  { %445 = vmatmul.msk.f32.vlgmr.msra.gmra.mxu1 %vm237_vm2, %v230_v46 }
 0x195   :  { %v234_v48 = vpop.permute.xlu1 %233 }
 0x197   :  { %v236_v49 = vpop.permute.xlu2 %235 }
 0x19d   :  { %v344_v0 = vpop.permute.xlu1 %343 }
 0x19e   :  { %v354_v3 = vsub.f32 %v334_v30, %v344_v0 }
 0x19f   :  { %v346_v9 = vpop.permute.xlu2 %345 }
 0x1a0   :  { %v358_v7 = vmul.f32 %v354_v3, %v330_v4  ;;  %v355_v13 = vsub.f32 %v335_v36, %v346_v9 }
 0x1a2   :  { %v359_v19 = vmul.f32 %v355_v13, %v331_v15 }
 0x1a5   :  { %v232_v47 = vpop.permute.xlu0 %231 }
 0x1a6   :  { %446 = vmatmul.msk.f32.gmra.mxu1 %vm237_vm2, %v232_v47 }
 0x1ad   :  { %v342_v53 = vpop.permute.xlu0 %341 }
 0x1ae   :  { %447 = vmatmul.msk.f32.gmra.mxu1 %vm237_vm2, %v234_v48  ;;  %v353_v55 = vsub.f32 %v333_v21, %v342_v53 }
 0x1b0   :  { %v357_v58 = vmul.f32 %v353_v55, %v329_v56 }
 0x1b5   :  { %v348_v22 = vpop.permute.xlu0 %347 }
 0x1b6   :  { %448 = vmatmul.msk.f32.gmra.mxu1 %vm237_vm2, %v236_v49  ;;  %v356_v25 = vsub.f32 %v336_v45, %v348_v22 }
 0x1b8   :  { %v360_v27 = vmul.f32 %v356_v25, %v332_v28 }
 0x205   :  { %v263_v57 = vpop.f32.mrf.mxu1 }
 0x206   :  { %v453_v59 = vadd.f32 -1.0, %v263_v57 }
 0x208   :  { %v365_v60 = vmul.f32 %v453_v59, %v357_v58 }
 0x20a   :  { %v370_v61 = vsel %vm369_vm3, %v365_v60, 0.0 }
 0x20b   :  { %371 = vadd.xlane.f32.xlu1 %v370_v61 }
 0x223   :  { %v266_v6 = vpop.f32.mrf.mxu1 }
 0x224   :  { %v454_v8 = vadd.f32 -1.0, %v266_v6 }
 0x226   :  { %v366_v11 = vmul.f32 %v454_v8, %v358_v7 }
 0x228   :  { %v373_v14 = vsel %vm369_vm3, %v366_v11, 0.0 }
 0x229   :  { %374 = vadd.xlane.f32.xlu2 %v373_v14 }
 0x22b   :  { %v269_v18 = vpop.f32.mrf.mxu1 }
 0x22c   :  { %v455_v20 = vadd.f32 -1.0, %v269_v18 }
 0x22e   :  { %v367_v24 = vmul.f32 %v455_v20, %v359_v19 }
 0x230   :  { %v376_v26 = vsel %vm369_vm3, %v367_v24, 0.0 }
 0x231   :  { %377 = vadd.xlane.f32.xlu0 %v376_v26 }
 0x233   :  { %v272_v29 = vpop.f32.mrf.mxu1 }
 0x234   :  { %v456_v30 = vadd.f32 -1.0, %v272_v29 }
 0x236   :  { %v368_v31 = vmul.f32 %v456_v30, %v360_v27 }
 0x238   :  { %v379_v17 = vsel %vm369_vm3, %v368_v31, 0.0 }
 0x239   :  { %380 = vadd.xlane.f32.xlu2 %v379_v17 }
 0x27e   :  { %v372_v32 = vpop.xlane.xlu1 %371 }
 0x27f   :  { %383 = vst.msk [vmem:[#allocation4] sm:$0xff] %vm382_vm4, %v372_v32 }
 0x286   :  { %v421_v33 = vld [vmem:[#allocation4] sm:$0xff] }
 0x287   :  { %422 = vst [vmem:[%s676_s7] sm:$0xff] %v421_v33 }
 0x29c   :  { %v375_v34 = vpop.xlane.xlu2 %374 }
 0x29d   :  { %384 = vst.msk [vmem:[#allocation4 + $0x8] sm:$0xff] %vm382_vm4, %v375_v34 }
 0x2a4   :  { %v423_v35 = vld [vmem:[#allocation4 + $0x8] sm:$0xff]  ;;  %v378_v37 = vpop.xlane.xlu0 %377 }
 0x2a5   :  { %424 = vst [vmem:[%s676_s7 + $0x8] sm:$0xff] %v423_v35 }
 0x2a6   :  { %385 = vst.msk [vmem:[#allocation4 + $0x10] sm:$0xff] %vm382_vm4, %v378_v37 }
 0x2ac   :  { %v381_v38 = vpop.xlane.xlu2 %380 }
 0x2ad   :  { %v425_v39 = vld [vmem:[#allocation4 + $0x10] sm:$0xff] }
 0x2ae   :  { %426 = vst [vmem:[%s676_s7 + $0x10] sm:$0xff] %v425_v39 }
 0x2af   :  { %432 = vsyncpa [#allocation3], 1 }

</bundles_post_ra>
